<compile_context>
chip_gen: v5e
topology: v5e:2x2
jax: 0.10.0
libtpu: 0.0.40
codegen_flags: <defaults>
</compile_context>

<pallas_src>
import math

import jax
import jax.numpy as jnp
from jax.experimental import pallas as pl
from jax.experimental.pallas import tpu as pltpu

LOG_SIG_MAX = 2.0
LOG_SIG_MIN = -20.0

_F32_MAX = float(jnp.finfo(jnp.float32).max)


def _round_up(x, m):
    return (x + m - 1) // m * m


def _pad2(a, rows, cols):
    return jnp.pad(a, ((0, rows - a.shape[0]), (0, cols - a.shape[1])))


# -----------------------------------------------------------------------------
# Kernel
# -----------------------------------------------------------------------------
def _policy_kernel(x_ref, w1_ref, b1_ref, w2_ref, b2_ref, wh_ref, bh_ref,
                   lo_ref, hi_ref, out_ref):
    # Layer 1: (tb, F_pad) @ (F_pad, H_pad) + bias, ReLU (bf16 in, f32 acc).
    h = jnp.dot(x_ref[...], w1_ref[...], preferred_element_type=jnp.float32)
    h = jnp.maximum(h + b1_ref[...], 0.0).astype(jnp.bfloat16)
    # Layer 2: (tb, H_pad) @ (H_pad, H_pad) + bias, ReLU.
    h = jnp.dot(h, w2_ref[...], preferred_element_type=jnp.float32)
    h = jnp.maximum(h + b2_ref[...], 0.0).astype(jnp.bfloat16)
    # Fused heads [mean | log_std] packed along lanes; per-lane clamp with the
    # precomputed lo/hi bound vectors (mean & padded lanes have +/-FLT_MAX
    # bounds -> pass-through; log_std lanes get [LOG_SIG_MIN, LOG_SIG_MAX]).
    o = jnp.dot(h, wh_ref[...], preferred_element_type=jnp.float32) + bh_ref[...]
    o = jnp.minimum(jnp.maximum(o, lo_ref[...]), hi_ref[...])
    out_ref[...] = o.astype(out_ref.dtype)


# -----------------------------------------------------------------------------
# One-time parameter preparation (hoisted out of the forward pass)
# -----------------------------------------------------------------------------
def prepare_policy_params(w1, b1, w2, b2, w_mean, b_mean, w_log_std, b_log_std):
    """Pad/cast weights once; returns kernel-ready tensors + dims."""
    F, H = w1.shape
    A = w_mean.shape[1]
    F_pad = _round_up(F, 128)
    H_pad = _round_up(H, 128)
    O_pad = _round_up(2 * A, 128)

    w1_p = _pad2(jnp.asarray(w1, jnp.bfloat16), F_pad, H_pad)
    b1_p = _pad2(jnp.asarray(b1, jnp.float32).reshape(1, -1), 1, H_pad)
    w2_p = _pad2(jnp.asarray(w2, jnp.bfloat16), H_pad, H_pad)
    b2_p = _pad2(jnp.asarray(b2, jnp.float32).reshape(1, -1), 1, H_pad)
    wh_p = _pad2(jnp.concatenate([jnp.asarray(w_mean, jnp.bfloat16),
                                  jnp.asarray(w_log_std, jnp.bfloat16)], axis=1),
                 H_pad, O_pad)
    bh_p = _pad2(jnp.concatenate([jnp.asarray(b_mean, jnp.float32).reshape(1, -1),
                                  jnp.asarray(b_log_std, jnp.float32).reshape(1, -1)],
                                 axis=1), 1, O_pad)

    lane = jnp.arange(O_pad)
    is_log_std = (lane >= A) & (lane < 2 * A)
    lo_p = jnp.where(is_log_std, LOG_SIG_MIN, -_F32_MAX).astype(jnp.float32)[None, :]
    hi_p = jnp.where(is_log_std, LOG_SIG_MAX, _F32_MAX).astype(jnp.float32)[None, :]

    return {
        "tensors": (w1_p, b1_p, w2_p, b2_p, wh_p, bh_p, lo_p, hi_p),
        "dims": {"F": F, "H": H, "A": A,
                 "F_pad": F_pad, "H_pad": H_pad, "O_pad": O_pad},
    }


# -----------------------------------------------------------------------------
# Tiling / VMEM helpers
# -----------------------------------------------------------------------------
def _select_batch_tile(B):
    if B <= 16:
        return 16
    # Ensure grid >= 2 so ("parallel",) can shard across both v7x TensorCores;
    # cap tile at 1024 rows (per-step overhead well amortized, VMEM still small).
    return min(1024, _round_up(pl.cdiv(B, 2), 16))


def _vmem_cap_bytes():
    try:
        phys = pltpu.get_tpu_info().vmem_capacity_bytes
    except Exception:
        phys = 64 << 20  # conservative (v7x-sized) if query unavailable
    # v5e/v6e: 128 MiB physical -> allow ~100 MiB scoped; v7x: 64 MiB -> ~48 MiB.
    return (100 << 20) if phys >= (128 << 20) else (48 << 20)


_PARAM_BUFFERED_OK = None  # memo: does this build accept pipeline_mode=pl.Buffered(1)?


# -----------------------------------------------------------------------------
# Forward
# -----------------------------------------------------------------------------
def pixel_policy_forward(latent, prepared, *, batch_tile=None,
                         out_dtype=jnp.bfloat16):
    """Fused PixelPolicyNetwork forward.

    latent:   (B, num_feature) float32 (or bfloat16)
    prepared: output of prepare_policy_params(...)
    returns (mean, log_std), each (B, action_dim) in latent's dtype.
    """
    global _PARAM_BUFFERED_OK

    d = prepared["dims"]
    F, A = d["F"], d["A"]
    F_pad, H_pad, O_pad = d["F_pad"], d["H_pad"], d["O_pad"]
    w1_p, b1_p, w2_p, b2_p, wh_p, bh_p, lo_p, hi_p = prepared["tensors"]

    B, Fin = latent.shape
    assert Fin == F, f"latent feature dim {Fin} != num_feature {F}"
    result_dtype = latent.dtype

    tb = batch_tile if batch_tile is not None else _select_batch_tile(B)
    assert tb % 16 == 0, "batch_tile must be a multiple of 16 (bf16 sublane packing)"
    B_pad = _round_up(B, tb)
    grid = (B_pad // tb,)

    # Single fused bf16 cast (+pad only if needed) — no f32 pad HBM round-trip.
    x_p = latent if latent.dtype == jnp.bfloat16 else latent.astype(jnp.bfloat16)
    if (B_pad != B) or (F_pad != F):
        x_p = _pad2(x_p, B_pad, F_pad)

    out_bytes = jnp.dtype(out_dtype).itemsize
    weight_bytes = ((F_pad * H_pad + H_pad * H_pad + H_pad * O_pad) * 2
                    + (2 * H_pad + 3 * O_pad) * 4)
    io_bytes = 2 * (tb * F_pad * 2 + tb * O_pad * out_bytes)   # double-buffered I/O
    act_bytes = tb * H_pad * 6 * 2                             # activation temps + margin
    cap = _vmem_cap_bytes()

    def build(buffered_params):
        weight_bufs = 1 if buffered_params else 2
        needed = weight_bufs * weight_bytes + io_bytes + act_bytes + (4 << 20)
        if needed > cap:
            # TODO(synk): add a K-tiling grid axis over F for layer 1 (marked
            # "arbitrary", f32 VMEM accumulator zeroed with pl.when(k == 0)) so
            # very large num_feature still fits v7x's 64 MiB VMEM.
            raise ValueError(
                f"resident-weight path needs ~{needed >> 20} MiB VMEM, cap is "
                f"{cap >> 20} MiB; K-tiling fallback not implemented")
        vmem_limit = int(min(max(needed, 16 << 20), cap))

        def pspec(shape):
            if buffered_params:
                # Constant index_map across the grid -> single-buffer the
                # resident parameters (halves their VMEM footprint).
                return pl.BlockSpec(shape, lambda i: (0, 0),
                                    pipeline_mode=pl.Buffered(1))
            return pl.BlockSpec(shape, lambda i: (0, 0))

        return pl.pallas_call(
            _policy_kernel,
            out_shape=jax.ShapeDtypeStruct((B_pad, O_pad), out_dtype),
            grid_spec=pltpu.PrefetchScalarGridSpec(
                num_scalar_prefetch=0,
                grid=grid,
                in_specs=[
                    pl.BlockSpec((tb, F_pad), lambda i: (i, 0)),  # batch tile
                    pspec((F_pad, H_pad)),   # w1
                    pspec((1, H_pad)),       # b1
                    pspec((H_pad, H_pad)),   # w2
                    pspec((1, H_pad)),       # b2
                    pspec((H_pad, O_pad)),   # fused heads weight
                    pspec((1, O_pad)),       # fused heads bias
                    pspec((1, O_pad)),       # per-lane lower clamp bound
                    pspec((1, O_pad)),       # per-lane upper clamp bound
                ],
                out_specs=pl.BlockSpec((tb, O_pad), lambda i: (i, 0)),
            ),
            compiler_params=pltpu.CompilerParams(
                dimension_semantics=("parallel",),
                vmem_limit_bytes=vmem_limit,
            ),
        )

    args = (x_p, w1_p, b1_p, w2_p, b2_p, wh_p, bh_p, lo_p, hi_p)
    if _PARAM_BUFFERED_OK is None:
        try:
            out = build(True)(*args)
            _PARAM_BUFFERED_OK = True
        except Exception:
            _PARAM_BUFFERED_OK = False
            out = build(False)(*args)
    else:
        out = build(_PARAM_BUFFERED_OK)(*args)

    # Tiny slice of the lane-packed output; cast back to the caller's dtype.
    mean = out[:B, :A].astype(result_dtype)
    log_std = out[:B, A:2 * A].astype(result_dtype)
    return mean, log_std


# -----------------------------------------------------------------------------
# Init / reference (PyTorch-equivalent)
# -----------------------------------------------------------------------------
def _xavier_uniform(key, fan_in, fan_out, gain=1.0):
    # Matches torch.nn.init.xavier_uniform_ (gain=1), generated directly in
    # (in, out) layout for x @ W (bound is symmetric in fan_in/fan_out).
    a = gain * math.sqrt(6.0 / (fan_in + fan_out))
    return jax.random.uniform(key, (fan_in, fan_out), jnp.float32, -a, a)


def init_policy_params(key, num_feature, hidden_dim, action_dim):
    k1, k2, k3, k4 = jax.random.split(key, 4)
    w1 = _xavier_uniform(k1, num_feature, hidden_dim)
    b1 = jnp.zeros((1, hidden_dim), jnp.float32)        # constant_(bias, 0)
    w2 = _xavier_uniform(k2, hidden_dim, hidden_dim)
    b2 = jnp.zeros((1, hidden_dim), jnp.float32)
    w_mean = _xavier_uniform(k3, hidden_dim, action_dim)
    b_mean = jnp.zeros((1, action_dim), jnp.float32)
    w_log_std = _xavier_uniform(k4, hidden_dim, action_dim)
    b_log_std = jnp.zeros((1, action_dim), jnp.float32)
    return w1, b1, w2, b2, w_mean, b_mean, w_log_std, b_log_std


def policy_reference(latent, w1, b1, w2, b2, w_mean, b_mean, w_log_std, b_log_std):
    x = jnp.maximum(latent @ w1 + b1, 0.0)
    x = jnp.maximum(x @ w2 + b2, 0.0)
    mean = x @ w_mean + b_mean
    log_std = jnp.clip(x @ w_log_std + b_log_std, LOG_SIG_MIN, LOG_SIG_MAX)
    return mean, log_std


if __name__ == "__main__":
    # Small shapes consistent with the module: latent feature vector -> policy.
    batch, num_feature, hidden_dim, action_dim = 8, 32, 64, 6

    key = jax.random.PRNGKey(0)
    k_params, k_state = jax.random.split(key)

    raw_params = init_policy_params(k_params, num_feature, hidden_dim, action_dim)
    latent = jax.random.normal(k_state, (batch, num_feature), dtype=jnp.float32)

    prepared = prepare_policy_params(*raw_params)      # one-time pad/cast of weights
    mean, log_std = pixel_policy_forward(latent, prepared)
    (mean, log_std) = jax.block_until_ready((mean, log_std))

    mean_ref, log_std_ref = policy_reference(latent, *raw_params)
    assert mean.shape == (batch, action_dim)
    assert log_std.shape == (batch, action_dim)
    # bf16 matmul inputs / activations / output with f32 accumulation ->
    # ~1e-2 relative error vs the f32 reference; tolerance loosened accordingly.
    assert jnp.allclose(mean, mean_ref, atol=5e-2, rtol=5e-2), "mean mismatch"
    assert jnp.allclose(log_std, log_std_ref, atol=5e-2, rtol=5e-2), "log_std mismatch"
    assert bool(jnp.all(log_std <= LOG_SIG_MAX)) and bool(jnp.all(log_std >= LOG_SIG_MIN))

    # TODO(synk): PixelPolicyNetwork.sample() (Normal rsample / tanh-squashed
    # log_prob) is stochastic and outside forward(); not implemented here.
    print("KERNEL_OK")
</pallas_src>

<mosaic_0001>
module attributes {stable_mosaic.version = 11 : i64} {
  func.func @_policy_kernel(%arg0: i32, %arg1: memref<16x128xbf16, #tpu.memory_space<vmem>>, %arg2: memref<128x128xbf16, #tpu.memory_space<vmem>>, %arg3: memref<1x128xf32, #tpu.memory_space<vmem>>, %arg4: memref<128x128xbf16, #tpu.memory_space<vmem>>, %arg5: memref<1x128xf32, #tpu.memory_space<vmem>>, %arg6: memref<128x128xbf16, #tpu.memory_space<vmem>>, %arg7: memref<1x128xf32, #tpu.memory_space<vmem>>, %arg8: memref<1x128xf32, #tpu.memory_space<vmem>>, %arg9: memref<1x128xf32, #tpu.memory_space<vmem>>, %arg10: memref<16x128xbf16, #tpu.memory_space<vmem>>) attributes {dimension_semantics = [#tpu.dimension_semantics<parallel>], iteration_bounds = array<i64: 1>, scalar_prefetch = 0 : i64, scratch_operands = 0 : i64, tpu.core_type = #tpu.core_type<tc>, window_params = [{transform_indices = @transform_0, window_bounds = array<i64: 16, 128>}, {pipeline_mode = #tpu.pipeline_mode<synchronous>, transform_indices = @transform_1, window_bounds = array<i64: 128, 128>}, {pipeline_mode = #tpu.pipeline_mode<synchronous>, transform_indices = @transform_2, window_bounds = array<i64: 1, 128>}, {pipeline_mode = #tpu.pipeline_mode<synchronous>, transform_indices = @transform_3, window_bounds = array<i64: 128, 128>}, {pipeline_mode = #tpu.pipeline_mode<synchronous>, transform_indices = @transform_4, window_bounds = array<i64: 1, 128>}, {pipeline_mode = #tpu.pipeline_mode<synchronous>, transform_indices = @transform_5, window_bounds = array<i64: 128, 128>}, {pipeline_mode = #tpu.pipeline_mode<synchronous>, transform_indices = @transform_6, window_bounds = array<i64: 1, 128>}, {pipeline_mode = #tpu.pipeline_mode<synchronous>, transform_indices = @transform_7, window_bounds = array<i64: 1, 128>}, {pipeline_mode = #tpu.pipeline_mode<synchronous>, transform_indices = @transform_8, window_bounds = array<i64: 1, 128>}, {transform_indices = @transform_9, window_bounds = array<i64: 16, 128>}]} {
    %c0 = arith.constant 0 : index
    %c0_0 = arith.constant 0 : index
    %0 = vector.load %arg1[%c0, %c0_0] : memref<16x128xbf16, #tpu.memory_space<vmem>>, vector<16x128xbf16>
    %c0_1 = arith.constant 0 : index
    %c0_2 = arith.constant 0 : index
    %1 = vector.load %arg2[%c0_1, %c0_2] : memref<128x128xbf16, #tpu.memory_space<vmem>>, vector<128x128xbf16>
    %cst = arith.constant dense<0.000000e+00> : vector<16x128xf32>
    %2 = tpu.matmul %0, %1, %cst {dimension_numbers = #tpu.dot_dimension_numbers<[1], [0], [0], [1], [0, 0, 1, 1], [], []>} : vector<16x128xbf16>, vector<128x128xbf16>, vector<16x128xf32> -> vector<16x128xf32>
    %c0_3 = arith.constant 0 : index
    %c0_4 = arith.constant 0 : index
    %3 = vector.load %arg3[%c0_3, %c0_4] : memref<1x128xf32, #tpu.memory_space<vmem>>, vector<1x128xf32>
    %4 = vector.broadcast %3 : vector<1x128xf32> to vector<16x128xf32>
    %5 = arith.addf %2, %4 : vector<16x128xf32>
    %cst_5 = arith.constant 0.000000e+00 : f32
    %6 = vector.broadcast %cst_5 : f32 to vector<16x128xf32>
    %7 = arith.maximumf %5, %6 : vector<16x128xf32>
    %8 = arith.truncf %7 : vector<16x128xf32> to vector<16x128xbf16>
    %c0_6 = arith.constant 0 : index
    %c0_7 = arith.constant 0 : index
    %9 = vector.load %arg4[%c0_6, %c0_7] : memref<128x128xbf16, #tpu.memory_space<vmem>>, vector<128x128xbf16>
    %cst_8 = arith.constant dense<0.000000e+00> : vector<16x128xf32>
    %10 = tpu.matmul %8, %9, %cst_8 {dimension_numbers = #tpu.dot_dimension_numbers<[1], [0], [0], [1], [0, 0, 1, 1], [], []>} : vector<16x128xbf16>, vector<128x128xbf16>, vector<16x128xf32> -> vector<16x128xf32>
    %c0_9 = arith.constant 0 : index
    %c0_10 = arith.constant 0 : index
    %11 = vector.load %arg5[%c0_9, %c0_10] : memref<1x128xf32, #tpu.memory_space<vmem>>, vector<1x128xf32>
    %12 = vector.broadcast %11 : vector<1x128xf32> to vector<16x128xf32>
    %13 = arith.addf %10, %12 : vector<16x128xf32>
    %cst_11 = arith.constant 0.000000e+00 : f32
    %14 = vector.broadcast %cst_11 : f32 to vector<16x128xf32>
    %15 = arith.maximumf %13, %14 : vector<16x128xf32>
    %16 = arith.truncf %15 : vector<16x128xf32> to vector<16x128xbf16>
    %c0_12 = arith.constant 0 : index
    %c0_13 = arith.constant 0 : index
    %17 = vector.load %arg6[%c0_12, %c0_13] : memref<128x128xbf16, #tpu.memory_space<vmem>>, vector<128x128xbf16>
    %cst_14 = arith.constant dense<0.000000e+00> : vector<16x128xf32>
    %18 = tpu.matmul %16, %17, %cst_14 {dimension_numbers = #tpu.dot_dimension_numbers<[1], [0], [0], [1], [0, 0, 1, 1], [], []>} : vector<16x128xbf16>, vector<128x128xbf16>, vector<16x128xf32> -> vector<16x128xf32>
    %c0_15 = arith.constant 0 : index
    %c0_16 = arith.constant 0 : index
    %19 = vector.load %arg7[%c0_15, %c0_16] : memref<1x128xf32, #tpu.memory_space<vmem>>, vector<1x128xf32>
    %20 = vector.broadcast %19 : vector<1x128xf32> to vector<16x128xf32>
    %21 = arith.addf %18, %20 : vector<16x128xf32>
    %c0_17 = arith.constant 0 : index
    %c0_18 = arith.constant 0 : index
    %22 = vector.load %arg8[%c0_17, %c0_18] : memref<1x128xf32, #tpu.memory_space<vmem>>, vector<1x128xf32>
    %23 = vector.broadcast %22 : vector<1x128xf32> to vector<16x128xf32>
    %24 = arith.maximumf %21, %23 : vector<16x128xf32>
    %c0_19 = arith.constant 0 : index
    %c0_20 = arith.constant 0 : index
    %25 = vector.load %arg9[%c0_19, %c0_20] : memref<1x128xf32, #tpu.memory_space<vmem>>, vector<1x128xf32>
    %26 = vector.broadcast %25 : vector<1x128xf32> to vector<16x128xf32>
    %27 = arith.minimumf %24, %26 : vector<16x128xf32>
    %28 = arith.truncf %27 : vector<16x128xf32> to vector<16x128xbf16>
    %c0_21 = arith.constant 0 : index
    %c0_22 = arith.constant 0 : index
    %29 = vector.load %arg10[%c0_21, %c0_22] : memref<16x128xbf16, #tpu.memory_space<vmem>>, vector<16x128xbf16>
    tpu.vector_store %arg10[%c0_21, %c0_22], %28 {strides = array<i32>} : memref<16x128xbf16, #tpu.memory_space<vmem>>, vector<16x128xbf16>,
    return
  }
  func.func @transform_0(%arg0: i32) -> (i32, i32) {
    %c0_i32 = arith.constant 0 : i32
    %c0_i32_0 = arith.constant 0 : i32
    return %arg0, %c0_i32 : i32, i32
  }
  func.func @transform_1(%arg0: i32) -> (i32, i32) {
    %c0_i32 = arith.constant 0 : i32
    %c0_i32_0 = arith.constant 0 : i32
    %c0_i32_1 = arith.constant 0 : i32
    return %c0_i32, %c0_i32_0 : i32, i32
  }
  func.func @transform_2(%arg0: i32) -> (i32, i32) {
    %c0_i32 = arith.constant 0 : i32
    %c0_i32_0 = arith.constant 0 : i32
    %c0_i32_1 = arith.constant 0 : i32
    return %c0_i32, %c0_i32_0 : i32, i32
  }
  func.func @transform_3(%arg0: i32) -> (i32, i32) {
    %c0_i32 = arith.constant 0 : i32
    %c0_i32_0 = arith.constant 0 : i32
    %c0_i32_1 = arith.constant 0 : i32
    return %c0_i32, %c0_i32_0 : i32, i32
  }
  func.func @transform_4(%arg0: i32) -> (i32, i32) {
    %c0_i32 = arith.constant 0 : i32
    %c0_i32_0 = arith.constant 0 : i32
    %c0_i32_1 = arith.constant 0 : i32
    return %c0_i32, %c0_i32_0 : i32, i32
  }
  func.func @transform_5(%arg0: i32) -> (i32, i32) {
    %c0_i32 = arith.constant 0 : i32
    %c0_i32_0 = arith.constant 0 : i32
    %c0_i32_1 = arith.constant 0 : i32
    return %c0_i32, %c0_i32_0 : i32, i32
  }
  func.func @transform_6(%arg0: i32) -> (i32, i32) {
    %c0_i32 = arith.constant 0 : i32
    %c0_i32_0 = arith.constant 0 : i32
    %c0_i32_1 = arith.constant 0 : i32
    return %c0_i32, %c0_i32_0 : i32, i32
  }
  func.func @transform_7(%arg0: i32) -> (i32, i32) {
    %c0_i32 = arith.constant 0 : i32
    %c0_i32_0 = arith.constant 0 : i32
    %c0_i32_1 = arith.constant 0 : i32
    return %c0_i32, %c0_i32_0 : i32, i32
  }
  func.func @transform_8(%arg0: i32) -> (i32, i32) {
    %c0_i32 = arith.constant 0 : i32
    %c0_i32_0 = arith.constant 0 : i32
    %c0_i32_1 = arith.constant 0 : i32
    return %c0_i32, %c0_i32_0 : i32, i32
  }
  func.func @transform_9(%arg0: i32) -> (i32, i32) {
    %c0_i32 = arith.constant 0 : i32
    %c0_i32_0 = arith.constant 0 : i32
    return %arg0, %c0_i32 : i32, i32
  }
}

module attributes {stable_mosaic.version = 11 : i64} {
  func.func @_policy_kernel(%arg0: i32, %arg1: memref<16x128xbf16, #tpu.memory_space<vmem>>, %arg2: memref<128x128xbf16, #tpu.memory_space<vmem>>, %arg3: memref<1x128xf32, #tpu.memory_space<vmem>>, %arg4: memref<128x128xbf16, #tpu.memory_space<vmem>>, %arg5: memref<1x128xf32, #tpu.memory_space<vmem>>, %arg6: memref<128x128xbf16, #tpu.memory_space<vmem>>, %arg7: memref<1x128xf32, #tpu.memory_space<vmem>>, %arg8: memref<1x128xf32, #tpu.memory_space<vmem>>, %arg9: memref<1x128xf32, #tpu.memory_space<vmem>>, %arg10: memref<16x128xbf16, #tpu.memory_space<vmem>>) attributes {dimension_semantics = [#tpu.dimension_semantics<parallel>], iteration_bounds = array<i64: 1>, scalar_prefetch = 0 : i64, scratch_operands = 0 : i64, tpu.core_type = #tpu.core_type<tc>, window_params = [{transform_indices = @transform_0, window_bounds = array<i64: 16, 128>}, {pipeline_mode = #tpu.pipeline_mode<synchronous>, transform_indices = @transform_1, window_bounds = array<i64: 128, 128>}, {pipeline_mode = #tpu.pipeline_mode<synchronous>, transform_indices = @transform_2, window_bounds = array<i64: 1, 128>}, {pipeline_mode = #tpu.pipeline_mode<synchronous>, transform_indices = @transform_3, window_bounds = array<i64: 128, 128>}, {pipeline_mode = #tpu.pipeline_mode<synchronous>, transform_indices = @transform_4, window_bounds = array<i64: 1, 128>}, {pipeline_mode = #tpu.pipeline_mode<synchronous>, transform_indices = @transform_5, window_bounds = array<i64: 128, 128>}, {pipeline_mode = #tpu.pipeline_mode<synchronous>, transform_indices = @transform_6, window_bounds = array<i64: 1, 128>}, {pipeline_mode = #tpu.pipeline_mode<synchronous>, transform_indices = @transform_7, window_bounds = array<i64: 1, 128>}, {pipeline_mode = #tpu.pipeline_mode<synchronous>, transform_indices = @transform_8, window_bounds = array<i64: 1, 128>}, {transform_indices = @transform_9, window_bounds = array<i64: 16, 128>}]} {
    %c0 = arith.constant 0 : index
    %c0_0 = arith.constant 0 : index
    %0 = vector.load %arg1[%c0, %c0_0] : memref<16x128xbf16, #tpu.memory_space<vmem>>, vector<16x128xbf16>
    %c0_1 = arith.constant 0 : index
    %c0_2 = arith.constant 0 : index
    %1 = vector.load %arg2[%c0_1, %c0_2] : memref<128x128xbf16, #tpu.memory_space<vmem>>, vector<128x128xbf16>
    %cst = arith.constant dense<0.000000e+00> : vector<16x128xf32>
    %2 = tpu.matmul %0, %1, %cst {dimension_numbers = #tpu.dot_dimension_numbers<[1], [0], [0], [1], [0, 0, 1, 1], [], []>} : vector<16x128xbf16>, vector<128x128xbf16>, vector<16x128xf32> -> vector<16x128xf32>
    %c0_3 = arith.constant 0 : index
    %c0_4 = arith.constant 0 : index
    %3 = vector.load %arg3[%c0_3, %c0_4] : memref<1x128xf32, #tpu.memory_space<vmem>>, vector<1x128xf32>
    %4 = vector.broadcast %3 : vector<1x128xf32> to vector<16x128xf32>
    %5 = arith.addf %2, %4 : vector<16x128xf32>
    %cst_5 = arith.constant 0.000000e+00 : f32
    %6 = vector.broadcast %cst_5 : f32 to vector<16x128xf32>
    %7 = arith.maximumf %5, %6 : vector<16x128xf32>
    %8 = arith.truncf %7 : vector<16x128xf32> to vector<16x128xbf16>
    %c0_6 = arith.constant 0 : index
    %c0_7 = arith.constant 0 : index
    %9 = vector.load %arg4[%c0_6, %c0_7] : memref<128x128xbf16, #tpu.memory_space<vmem>>, vector<128x128xbf16>
    %cst_8 = arith.constant dense<0.000000e+00> : vector<16x128xf32>
    %10 = tpu.matmul %8, %9, %cst_8 {dimension_numbers = #tpu.dot_dimension_numbers<[1], [0], [0], [1], [0, 0, 1, 1], [], []>} : vector<16x128xbf16>, vector<128x128xbf16>, vector<16x128xf32> -> vector<16x128xf32>
    %c0_9 = arith.constant 0 : index
    %c0_10 = arith.constant 0 : index
    %11 = vector.load %arg5[%c0_9, %c0_10] : memref<1x128xf32, #tpu.memory_space<vmem>>, vector<1x128xf32>
    %12 = vector.broadcast %11 : vector<1x128xf32> to vector<16x128xf32>
    %13 = arith.addf %10, %12 : vector<16x128xf32>
    %cst_11 = arith.constant 0.000000e+00 : f32
    %14 = vector.broadcast %cst_11 : f32 to vector<16x128xf32>
    %15 = arith.maximumf %13, %14 : vector<16x128xf32>
    %16 = arith.truncf %15 : vector<16x128xf32> to vector<16x128xbf16>
    %c0_12 = arith.constant 0 : index
    %c0_13 = arith.constant 0 : index
    %17 = vector.load %arg6[%c0_12, %c0_13] : memref<128x128xbf16, #tpu.memory_space<vmem>>, vector<128x128xbf16>
    %cst_14 = arith.constant dense<0.000000e+00> : vector<16x128xf32>
    %18 = tpu.matmul %16, %17, %cst_14 {dimension_numbers = #tpu.dot_dimension_numbers<[1], [0], [0], [1], [0, 0, 1, 1], [], []>} : vector<16x128xbf16>, vector<128x128xbf16>, vector<16x128xf32> -> vector<16x128xf32>
    %c0_15 = arith.constant 0 : index
    %c0_16 = arith.constant 0 : index
    %19 = vector.load %arg7[%c0_15, %c0_16] : memref<1x128xf32, #tpu.memory_space<vmem>>, vector<1x128xf32>
    %20 = vector.broadcast %19 : vector<1x128xf32> to vector<16x128xf32>
    %21 = arith.addf %18, %20 : vector<16x128xf32>
    %c0_17 = arith.constant 0 : index
    %c0_18 = arith.constant 0 : index
    %22 = vector.load %arg8[%c0_17, %c0_18] : memref<1x128xf32, #tpu.memory_space<vmem>>, vector<1x128xf32>
    %23 = vector.broadcast %22 : vector<1x128xf32> to vector<16x128xf32>
    %24 = arith.maximumf %21, %23 : vector<16x128xf32>
    %c0_19 = arith.constant 0 : index
    %c0_20 = arith.constant 0 : index
    %25 = vector.load %arg9[%c0_19, %c0_20] : memref<1x128xf32, #tpu.memory_space<vmem>>, vector<1x128xf32>
    %26 = vector.broadcast %25 : vector<1x128xf32> to vector<16x128xf32>
    %27 = arith.minimumf %24, %26 : vector<16x128xf32>
    %28 = arith.truncf %27 : vector<16x128xf32> to vector<16x128xbf16>
    %c0_21 = arith.constant 0 : index
    %c0_22 = arith.constant 0 : index
    %29 = vector.load %arg10[%c0_21, %c0_22] : memref<16x128xbf16, #tpu.memory_space<vmem>>, vector<16x128xbf16>
    tpu.vector_store %arg10[%c0_21, %c0_22], %28 {strides = array<i32>} : memref<16x128xbf16, #tpu.memory_space<vmem>>, vector<16x128xbf16>,
    return
  }
  func.func @transform_0(%arg0: i32) -> (i32, i32) {
    %c0_i32 = arith.constant 0 : i32
    %c0_i32_0 = arith.constant 0 : i32
    return %arg0, %c0_i32 : i32, i32
  }
  func.func @transform_1(%arg0: i32) -> (i32, i32) {
    %c0_i32 = arith.constant 0 : i32
    %c0_i32_0 = arith.constant 0 : i32
    %c0_i32_1 = arith.constant 0 : i32
    return %c0_i32, %c0_i32_0 : i32, i32
  }
  func.func @transform_2(%arg0: i32) -> (i32, i32) {
    %c0_i32 = arith.constant 0 : i32
    %c0_i32_0 = arith.constant 0 : i32
    %c0_i32_1 = arith.constant 0 : i32
    return %c0_i32, %c0_i32_0 : i32, i32
  }
  func.func @transform_3(%arg0: i32) -> (i32, i32) {
    %c0_i32 = arith.constant 0 : i32
    %c0_i32_0 = arith.constant 0 : i32
    %c0_i32_1 = arith.constant 0 : i32
    return %c0_i32, %c0_i32_0 : i32, i32
  }
  func.func @transform_4(%arg0: i32) -> (i32, i32) {
    %c0_i32 = arith.constant 0 : i32
    %c0_i32_0 = arith.constant 0 : i32
    %c0_i32_1 = arith.constant 0 : i32
    return %c0_i32, %c0_i32_0 : i32, i32
  }
  func.func @transform_5(%arg0: i32) -> (i32, i32) {
    %c0_i32 = arith.constant 0 : i32
    %c0_i32_0 = arith.constant 0 : i32
    %c0_i32_1 = arith.constant 0 : i32
    return %c0_i32, %c0_i32_0 : i32, i32
  }
  func.func @transform_6(%arg0: i32) -> (i32, i32) {
    %c0_i32 = arith.constant 0 : i32
    %c0_i32_0 = arith.constant 0 : i32
    %c0_i32_1 = arith.constant 0 : i32
    return %c0_i32, %c0_i32_0 : i32, i32
  }
  func.func @transform_7(%arg0: i32) -> (i32, i32) {
    %c0_i32 = arith.constant 0 : i32
    %c0_i32_0 = arith.constant 0 : i32
    %c0_i32_1 = arith.constant 0 : i32
    return %c0_i32, %c0_i32_0 : i32, i32
  }
  func.func @transform_8(%arg0: i32) -> (i32, i32) {
    %c0_i32 = arith.constant 0 : i32
    %c0_i32_0 = arith.constant 0 : i32
    %c0_i32_1 = arith.constant 0 : i32
    return %c0_i32, %c0_i32_0 : i32, i32
  }
  func.func @transform_9(%arg0: i32) -> (i32, i32) {
    %c0_i32 = arith.constant 0 : i32
    %c0_i32_0 = arith.constant 0 : i32
    return %arg0, %c0_i32 : i32, i32
  }
}

</mosaic_0001>

<bundles_post_ra>
// kernel: tpu_custom_call.1
= control target key start
LH: loop header
LB: loop body
LE: loop exit
PB: predicated region body
PF: predicated region fallthrough
CT: control target
= control target key end

     0   :  { %14 = vsyncpa [#allocation3], 0  ;;  %s765_s0 = inlined_call_operand.hbm [shape: bf16[16,128], index: 0, kind: input, shape index: {}]   ;;  %s766_s1 = inlined_call_operand.hbm [shape: bf16[128,128], index: 1, kind: input, shape index: {}]   ;;  %s767_s2 = inlined_call_operand.vmem [shape: f32[1,128], index: 2, kind: input, shape index: {}]   ;;  %s768_s3 = inlined_call_operand.hbm [shape: bf16[128,128], index: 3, kind: input, shape index: {}]   ;;  %s769_s4 = inlined_call_operand.vmem [shape: f32[1,128], index: 4, kind: input, shape index: {}]   ;;  %s770_s5 = inlined_call_operand.hbm [shape: bf16[128,128], index: 5, kind: input, shape index: {}]   ;;  %s771_s6 = inlined_call_operand.vmem [shape: f32[1,128], index: 6, kind: input, shape index: {}]   ;;  %s772_s7 = inlined_call_operand.vmem [shape: f32[1,128], index: 7, kind: input, shape index: {}]   ;;  %s773_s8 = inlined_call_operand.vmem [shape: f32[1,128], index: 8, kind: input, shape index: {}]   ;;  %s774_s9 = inlined_call_operand.hbm [shape: bf16[16,128], index: 9, kind: output, shape index: {}]  }
   0x1   :  { %15 = vsyncpa [#allocation6], 0 }
   0x2   :  { %16 = vsyncpa [#allocation9], 0 }
   0x3   :  { %17 = vsyncpa [#allocation4], 0  ;;  %s35_s11 = sshll.u32 %s766_s1, 4  ;;  %s663_s12 = smov [#allocation5]   ;;  %s36_s11 = int_to_ptr.hbm [resolvable:$true] %s35_s11 }
   0x4   :  { %s37_s13 = sshll.u32 %s663_s12, 4  ;;  %s22_s16 = sshll.u32 %s765_s0, 4  ;;  %s38_s13 = int_to_ptr.vmem [resolvable:$true] %s37_s13  ;;  %s23_s16 = int_to_ptr.hbm [resolvable:$true] %s22_s16 }
   0x5   :  { %s664_s17 = smov 64   ;;  %s665_s18 = smov 4  }
   0x6   :  { %43 = dma.hbm_to_vmem [thread:$0]  %s36_s11, 1024, %s38_s13, [#allocation6], %s664_s17, %s664_s17, %s665_s18  }
   0x7   :  { %s666_s19 = smov [#allocation2]   ;;  %s50_s1 = sshll.u32 %s768_s3, 4  ;;  %s51_s1 = int_to_ptr.hbm [resolvable:$true] %s50_s1 }
   0x8   :  { %s24_s20 = sshll.u32 %s666_s19, 4  ;;  %s65_s24 = sshll.u32 %s770_s5, 4  ;;  %s25_s20 = int_to_ptr.vmem [resolvable:$true] %s24_s20  ;;  %s66_s24 = int_to_ptr.hbm [resolvable:$true] %s65_s24 }
   0x9   :  { %30 = dma.hbm_to_vmem [thread:$0]  %s23_s16, 128, %s25_s20, [#allocation3], %s664_s17, %s664_s17, %s665_s18  }
   0xa   :  { %s667_s25 = smov [#allocation7]   ;;  %s668_s27 = smov [#allocation8]  }
   0xb   :  { %s52_s26 = sshll.u32 %s667_s25, 4  ;;  %s67_s3 = sshll.u32 %s668_s27, 4  ;;  %s53_s26 = int_to_ptr.vmem [resolvable:$true] %s52_s26  ;;  %s68_s3 = int_to_ptr.vmem [resolvable:$true] %s67_s3 }
   0xc   :  { %58 = dma.hbm_to_vmem [thread:$0]  %s51_s1, 1024, %s53_s26, [#allocation6], %s664_s17, %s664_s17, %s665_s18  }
   0xd   :  { %73 = dma.hbm_to_vmem [thread:$0]  %s66_s24, 1024, %s68_s3, [#allocation9], %s664_s17, %s664_s17, %s665_s18  }
   0xe   :  { %655 = dma.done.wait [#allocation3], 128  }
   0xf   :  { %656 = vsyncadd [#allocation3], 4294967168 }
  0x10   :  { %657 = dma.done.wait [#allocation6], 2048  }
  0x11   :  { %658 = vsyncadd [#allocation6], 4294965248 }
  0x12   :  { %659 = dma.done.wait [#allocation9], 1024  }
  0x13   :  { %660 = vsyncadd [#allocation9], 4294966272  ;;  %v501_v0 = vld [vmem:[#allocation5 + $0x38] sm:$0xff]  ;;  %v500_v1 = vld [vmem:[#allocation5 + $0x30] sm:$0xff]  ;;  %s669_s14 = smov [#allocation10]   ;;  %s378_s20 = sshll.u32 %s774_s9, 4  ;;  %s379_s20 = int_to_ptr.hbm [resolvable:$true] %s378_s20 }
  0x14   :  { %172 = vmatpush.bf16.msra.mxu0 %v501_v0  ;;  %v509_v2 = vld [vmem:[#allocation7 + $0x38] sm:$0xff]  ;;  %v508_v3 = vld [vmem:[#allocation7 + $0x30] sm:$0xff]  ;;  %v499_v4 = vld [vmem:[#allocation5 + $0x28] sm:$0xff]  ;;  %s376_s15 = sshll.u32 %s669_s14, 4  ;;  %s377_s15 = int_to_ptr.vmem [resolvable:$true] %s376_s15 }
  0x15   :  { %257 = vmatpush.bf16.msra.mxu1 %v509_v2  ;;  %v507_v5 = vld [vmem:[#allocation7 + $0x28] sm:$0xff]  ;;  %v498_v6 = vld [vmem:[#allocation5 + $0x20] sm:$0xff]  ;;  %v497_v8 = vld [vmem:[#allocation5 + $0x18] sm:$0xff] }
  0x16   :  { %v506_v7 = vld [vmem:[#allocation7 + $0x20] sm:$0xff]  ;;  %v496_v9 = vld [vmem:[#allocation5 + $0x10] sm:$0xff]  ;;  %v495_v10 = vld [vmem:[#allocation5 + $0x8] sm:$0xff] }
  0x17   :  { %v494_v11 = vld [vmem:[#allocation5] sm:$0xff]  ;;  %v493_v12 = vld [vmem:[#allocation2] sm:$0xff]  ;;  %v504_v14 = vld [vmem:[#allocation7 + $0x10] sm:$0xff] }
  0x18   :  { %173 = vmatpush.bf16.msra.mxu0 %v500_v1  ;;  %v505_v13 = vld [vmem:[#allocation7 + $0x18] sm:$0xff]  ;;  %v503_v15 = vld [vmem:[#allocation7 + $0x8] sm:$0xff]  ;;  %v502_v16 = vld [vmem:[#allocation7] sm:$0xff] }
  0x19   :  { %258 = vmatpush.bf16.msra.mxu1 %v508_v3  ;;  %v517_v17 = vld [vmem:[#allocation8 + $0x38] sm:$0xff]  ;;  %v516_v18 = vld [vmem:[#allocation8 + $0x30] sm:$0xff]  ;;  %v515_v19 = vld [vmem:[#allocation8 + $0x28] sm:$0xff] }
  0x1a   :  { %342 = vmatpush.bf16.msra.mxu2 %v517_v17  ;;  %v514_v20 = vld [vmem:[#allocation8 + $0x20] sm:$0xff]  ;;  %v530_v22 = vld [vmem:[%s767_s2] ss:$0 sm:$0xff]  ;;  %v512_v30 = vld [vmem:[#allocation8 + $0x10] sm:$0xff] }
  0x1b   :  { %v513_v29 = vld [vmem:[#allocation8 + $0x18] sm:$0xff]  ;;  %v511_v31 = vld [vmem:[#allocation8 + $0x8] sm:$0xff]  ;;  %v510_v32 = vld [vmem:[#allocation8] sm:$0xff] }
  0x1c   :  { %174 = vmatpush.bf16.msra.mxu0 %v499_v4  ;;  %v531_v34 = vld [vmem:[%s769_s4] ss:$0 sm:$0xff] }
  0x1d   :  { %259 = vmatpush.bf16.msra.mxu1 %v507_v5  ;;  %v532_v42 = vld [vmem:[%s771_s6] ss:$0 sm:$0xff] }
  0x1e   :  { %343 = vmatpush.bf16.msra.mxu2 %v516_v18  ;;  %v533_v44 = vld [vmem:[%s772_s7] ss:$0 sm:$0xff] }
  0x1f   :  { %v534_v47 = vld [vmem:[%s773_s8] ss:$0 sm:$0xff] }
  0x20   :  { %175 = vmatpush.bf16.msra.mxu0 %v498_v6 }
  0x21   :  { %260 = vmatpush.bf16.msra.mxu1 %v506_v7 }
  0x22   :  { %344 = vmatpush.bf16.msra.mxu2 %v515_v19 }
  0x24   :  { %176 = vmatpush.bf16.msra.mxu0 %v497_v8 }
  0x25   :  { %261 = vmatpush.bf16.msra.mxu1 %v505_v13 }
  0x26   :  { %345 = vmatpush.bf16.msra.mxu2 %v514_v20 }
  0x28   :  { %177 = vmatpush.bf16.msra.mxu0 %v496_v9 }
  0x29   :  { %262 = vmatpush.bf16.msra.mxu1 %v504_v14 }
  0x2a   :  { %346 = vmatpush.bf16.msra.mxu2 %v513_v29 }
  0x2c   :  { %178 = vmatpush.bf16.msra.mxu0 %v495_v10 }
  0x2d   :  { %263 = vmatpush.bf16.msra.mxu1 %v503_v15 }
  0x2e   :  { %347 = vmatpush.bf16.msra.mxu2 %v512_v30 }
  0x30   :  { %179 = vmatpush.bf16.msra.mxu0 %v494_v11 }
  0x31   :  { %264 = vmatpush.bf16.msra.mxu1 %v502_v16 }
  0x32   :  { %348 = vmatpush.bf16.msra.mxu2 %v511_v31 }
  0x33   :  { %180 = vmatmul.bf16.vlgmr.msra.gmra.mxu0 %v493_v12 }
  0x36   :  { %349 = vmatpush.bf16.msra.mxu2 %v510_v32 }
  0xb0   :  { %v181_v21 = vpop.f32.mrf.mxu0 }
  0xb1   :  { %v182_v23 = vadd.f32 %v530_v22, %v181_v21 }
  0xb3   :  { %v186_v26 = vmax.f32 %v182_v23, 0.0 }
  0xb8   :  { %v183_v24 = vpop.f32.mrf.mxu0 }
  0xb9   :  { %v184_v25 = vadd.f32 %v530_v22, %v183_v24 }
  0xbb   :  { %v187_v27 = vmax.f32 %v184_v25, 0.0 }
  0xbd   :  { %v188_v28 = vpack.c.bf16 %v187_v27, %v186_v26 }
  0xbf   :  { %265 = vmatmul.bf16.vlgmr.msra.gmra.mxu1 %v188_v28 }
 0x13c   :  { %v266_v33 = vpop.f32.mrf.mxu1 }
 0x13d   :  { %v267_v35 = vadd.f32 %v531_v34, %v266_v33 }
 0x13f   :  { %v271_v38 = vmax.f32 %v267_v35, 0.0 }
 0x144   :  { %v268_v36 = vpop.f32.mrf.mxu1 }
 0x145   :  { %v269_v37 = vadd.f32 %v531_v34, %v268_v36 }
 0x147   :  { %v272_v39 = vmax.f32 %v269_v37, 0.0 }
 0x149   :  { %v273_v40 = vpack.c.bf16 %v272_v39, %v271_v38 }
 0x14b   :  { %350 = vmatmul.bf16.vlgmr.msra.gmra.mxu2 %v273_v40 }
 0x1ce   :  { %v351_v41 = vpop.f32.mrf.mxu2 }
 0x1cf   :  { %v352_v43 = vadd.f32 %v532_v42, %v351_v41 }
 0x1d1   :  { %v360_v46 = vmax.f32 %v352_v43, %v533_v44 }
 0x1d3   :  { %v366_v50 = vmin.f32 %v360_v46, %v534_v47 }
 0x1d6   :  { %v353_v45 = vpop.f32.mrf.mxu2 }
 0x1d7   :  { %v354_v48 = vadd.f32 %v532_v42, %v353_v45 }
 0x1d9   :  { %v361_v49 = vmax.f32 %v354_v48, %v533_v44 }
 0x1db   :  { %v367_v51 = vmin.f32 %v361_v49, %v534_v47 }
 0x1dd   :  { %v521_v52 = vpack.c.bf16 %v367_v51, %v366_v50 }
 0x1df   :  { %522 = vst [vmem:[#allocation10] sm:$0xff] %v521_v52  }
 0x1e0   :  { %384 = dma.vmem_to_hbm [thread:$0]  %s377_s15, 128, %s379_s20, [#allocation4], %s664_s17, %s664_s17, %s665_s18  }
 0x1e1   :  { %661 = dma.done.wait [#allocation4], 128  }
 0x1e2   :  { %662 = vsyncadd [#allocation4], 4294967168 }
 0x1e3   :  { %389 = vsyncpa [#allocation3], 1 }
 0x1e4   :  { %390 = vsyncpa [#allocation6], 1 }
 0x1e5   :  { %391 = vsyncpa [#allocation9], 1 }
 0x1e6   :  { %392 = vsyncpa [#allocation4], 1 }

// kernel: tpu_custom_call.1
= control target key start
LH: loop header
LB: loop body
LE: loop exit
PB: predicated region body
PF: predicated region fallthrough
CT: control target
= control target key end

     0   :  { %14 = vsyncpa [#allocation3], 0  ;;  %s765_s0 = inlined_call_operand.hbm [shape: bf16[16,128], index: 0, kind: input, shape index: {}]   ;;  %s766_s1 = inlined_call_operand.hbm [shape: bf16[128,128], index: 1, kind: input, shape index: {}]   ;;  %s767_s2 = inlined_call_operand.vmem [shape: f32[1,128], index: 2, kind: input, shape index: {}]   ;;  %s768_s3 = inlined_call_operand.hbm [shape: bf16[128,128], index: 3, kind: input, shape index: {}]   ;;  %s769_s4 = inlined_call_operand.vmem [shape: f32[1,128], index: 4, kind: input, shape index: {}]   ;;  %s770_s5 = inlined_call_operand.hbm [shape: bf16[128,128], index: 5, kind: input, shape index: {}]   ;;  %s771_s6 = inlined_call_operand.vmem [shape: f32[1,128], index: 6, kind: input, shape index: {}]   ;;  %s772_s7 = inlined_call_operand.vmem [shape: f32[1,128], index: 7, kind: input, shape index: {}]   ;;  %s773_s8 = inlined_call_operand.vmem [shape: f32[1,128], index: 8, kind: input, shape index: {}]   ;;  %s774_s9 = inlined_call_operand.hbm [shape: bf16[16,128], index: 9, kind: output, shape index: {}]  }
   0x1   :  { %15 = vsyncpa [#allocation6], 0 }
   0x2   :  { %16 = vsyncpa [#allocation9], 0 }
   0x3   :  { %17 = vsyncpa [#allocation4], 0  ;;  %s35_s11 = sshll.u32 %s766_s1, 4  ;;  %s663_s12 = smov [#allocation5]   ;;  %s36_s11 = int_to_ptr.hbm [resolvable:$true] %s35_s11 }
   0x4   :  { %s37_s13 = sshll.u32 %s663_s12, 4  ;;  %s22_s16 = sshll.u32 %s765_s0, 4  ;;  %s38_s13 = int_to_ptr.vmem [resolvable:$true] %s37_s13  ;;  %s23_s16 = int_to_ptr.hbm [resolvable:$true] %s22_s16 }
   0x5   :  { %s664_s17 = smov 64   ;;  %s665_s18 = smov 4  }
   0x6   :  { %43 = dma.hbm_to_vmem [thread:$0]  %s36_s11, 1024, %s38_s13, [#allocation6], %s664_s17, %s664_s17, %s665_s18  }
   0x7   :  { %s666_s19 = smov [#allocation2]   ;;  %s50_s1 = sshll.u32 %s768_s3, 4  ;;  %s51_s1 = int_to_ptr.hbm [resolvable:$true] %s50_s1 }
   0x8   :  { %s24_s20 = sshll.u32 %s666_s19, 4  ;;  %s65_s24 = sshll.u32 %s770_s5, 4  ;;  %s25_s20 = int_to_ptr.vmem [resolvable:$true] %s24_s20  ;;  %s66_s24 = int_to_ptr.hbm [resolvable:$true] %s65_s24 }
   0x9   :  { %30 = dma.hbm_to_vmem [thread:$0]  %s23_s16, 128, %s25_s20, [#allocation3], %s664_s17, %s664_s17, %s665_s18  }
   0xa   :  { %s667_s25 = smov [#allocation7]   ;;  %s668_s27 = smov [#allocation8]  }
   0xb   :  { %s52_s26 = sshll.u32 %s667_s25, 4  ;;  %s67_s3 = sshll.u32 %s668_s27, 4  ;;  %s53_s26 = int_to_ptr.vmem [resolvable:$true] %s52_s26  ;;  %s68_s3 = int_to_ptr.vmem [resolvable:$true] %s67_s3 }
   0xc   :  { %58 = dma.hbm_to_vmem [thread:$0]  %s51_s1, 1024, %s53_s26, [#allocation6], %s664_s17, %s664_s17, %s665_s18  }
   0xd   :  { %73 = dma.hbm_to_vmem [thread:$0]  %s66_s24, 1024, %s68_s3, [#allocation9], %s664_s17, %s664_s17, %s665_s18  }
   0xe   :  { %655 = dma.done.wait [#allocation3], 128  }
   0xf   :  { %656 = vsyncadd [#allocation3], 4294967168 }
  0x10   :  { %657 = dma.done.wait [#allocation6], 2048  }
  0x11   :  { %658 = vsyncadd [#allocation6], 4294965248 }
  0x12   :  { %659 = dma.done.wait [#allocation9], 1024  }
  0x13   :  { %660 = vsyncadd [#allocation9], 4294966272  ;;  %v501_v0 = vld [vmem:[#allocation5 + $0x38] sm:$0xff]  ;;  %v500_v1 = vld [vmem:[#allocation5 + $0x30] sm:$0xff]  ;;  %s669_s14 = smov [#allocation10]   ;;  %s378_s20 = sshll.u32 %s774_s9, 4  ;;  %s379_s20 = int_to_ptr.hbm [resolvable:$true] %s378_s20 }
  0x14   :  { %172 = vmatpush.bf16.msra.mxu0 %v501_v0  ;;  %v509_v2 = vld [vmem:[#allocation7 + $0x38] sm:$0xff]  ;;  %v508_v3 = vld [vmem:[#allocation7 + $0x30] sm:$0xff]  ;;  %v499_v4 = vld [vmem:[#allocation5 + $0x28] sm:$0xff]  ;;  %s376_s15 = sshll.u32 %s669_s14, 4  ;;  %s377_s15 = int_to_ptr.vmem [resolvable:$true] %s376_s15 }
  0x15   :  { %257 = vmatpush.bf16.msra.mxu1 %v509_v2  ;;  %v507_v5 = vld [vmem:[#allocation7 + $0x28] sm:$0xff]  ;;  %v498_v6 = vld [vmem:[#allocation5 + $0x20] sm:$0xff]  ;;  %v497_v8 = vld [vmem:[#allocation5 + $0x18] sm:$0xff] }
  0x16   :  { %v506_v7 = vld [vmem:[#allocation7 + $0x20] sm:$0xff]  ;;  %v496_v9 = vld [vmem:[#allocation5 + $0x10] sm:$0xff]  ;;  %v495_v10 = vld [vmem:[#allocation5 + $0x8] sm:$0xff] }
  0x17   :  { %v494_v11 = vld [vmem:[#allocation5] sm:$0xff]  ;;  %v493_v12 = vld [vmem:[#allocation2] sm:$0xff]  ;;  %v504_v14 = vld [vmem:[#allocation7 + $0x10] sm:$0xff] }
  0x18   :  { %173 = vmatpush.bf16.msra.mxu0 %v500_v1  ;;  %v505_v13 = vld [vmem:[#allocation7 + $0x18] sm:$0xff]  ;;  %v503_v15 = vld [vmem:[#allocation7 + $0x8] sm:$0xff]  ;;  %v502_v16 = vld [vmem:[#allocation7] sm:$0xff] }
  0x19   :  { %258 = vmatpush.bf16.msra.mxu1 %v508_v3  ;;  %v517_v17 = vld [vmem:[#allocation8 + $0x38] sm:$0xff]  ;;  %v516_v18 = vld [vmem:[#allocation8 + $0x30] sm:$0xff]  ;;  %v515_v19 = vld [vmem:[#allocation8 + $0x28] sm:$0xff] }
  0x1a   :  { %342 = vmatpush.bf16.msra.mxu2 %v517_v17  ;;  %v514_v20 = vld [vmem:[#allocation8 + $0x20] sm:$0xff]  ;;  %v530_v22 = vld [vmem:[%s767_s2] ss:$0 sm:$0xff]  ;;  %v512_v30 = vld [vmem:[#allocation8 + $0x10] sm:$0xff] }
  0x1b   :  { %v513_v29 = vld [vmem:[#allocation8 + $0x18] sm:$0xff]  ;;  %v511_v31 = vld [vmem:[#allocation8 + $0x8] sm:$0xff]  ;;  %v510_v32 = vld [vmem:[#allocation8] sm:$0xff] }
  0x1c   :  { %174 = vmatpush.bf16.msra.mxu0 %v499_v4  ;;  %v531_v34 = vld [vmem:[%s769_s4] ss:$0 sm:$0xff] }
  0x1d   :  { %259 = vmatpush.bf16.msra.mxu1 %v507_v5  ;;  %v532_v42 = vld [vmem:[%s771_s6] ss:$0 sm:$0xff] }
  0x1e   :  { %343 = vmatpush.bf16.msra.mxu2 %v516_v18  ;;  %v533_v44 = vld [vmem:[%s772_s7] ss:$0 sm:$0xff] }
  0x1f   :  { %v534_v47 = vld [vmem:[%s773_s8] ss:$0 sm:$0xff] }
  0x20   :  { %175 = vmatpush.bf16.msra.mxu0 %v498_v6 }
  0x21   :  { %260 = vmatpush.bf16.msra.mxu1 %v506_v7 }
  0x22   :  { %344 = vmatpush.bf16.msra.mxu2 %v515_v19 }
  0x24   :  { %176 = vmatpush.bf16.msra.mxu0 %v497_v8 }
  0x25   :  { %261 = vmatpush.bf16.msra.mxu1 %v505_v13 }
  0x26   :  { %345 = vmatpush.bf16.msra.mxu2 %v514_v20 }
  0x28   :  { %177 = vmatpush.bf16.msra.mxu0 %v496_v9 }
  0x29   :  { %262 = vmatpush.bf16.msra.mxu1 %v504_v14 }
  0x2a   :  { %346 = vmatpush.bf16.msra.mxu2 %v513_v29 }
  0x2c   :  { %178 = vmatpush.bf16.msra.mxu0 %v495_v10 }
  0x2d   :  { %263 = vmatpush.bf16.msra.mxu1 %v503_v15 }
  0x2e   :  { %347 = vmatpush.bf16.msra.mxu2 %v512_v30 }
  0x30   :  { %179 = vmatpush.bf16.msra.mxu0 %v494_v11 }
  0x31   :  { %264 = vmatpush.bf16.msra.mxu1 %v502_v16 }
  0x32   :  { %348 = vmatpush.bf16.msra.mxu2 %v511_v31 }
  0x33   :  { %180 = vmatmul.bf16.vlgmr.msra.gmra.mxu0 %v493_v12 }
  0x36   :  { %349 = vmatpush.bf16.msra.mxu2 %v510_v32 }
  0xb0   :  { %v181_v21 = vpop.f32.mrf.mxu0 }
  0xb1   :  { %v182_v23 = vadd.f32 %v530_v22, %v181_v21 }
  0xb3   :  { %v186_v26 = vmax.f32 %v182_v23, 0.0 }
  0xb8   :  { %v183_v24 = vpop.f32.mrf.mxu0 }
  0xb9   :  { %v184_v25 = vadd.f32 %v530_v22, %v183_v24 }
  0xbb   :  { %v187_v27 = vmax.f32 %v184_v25, 0.0 }
  0xbd   :  { %v188_v28 = vpack.c.bf16 %v187_v27, %v186_v26 }
  0xbf   :  { %265 = vmatmul.bf16.vlgmr.msra.gmra.mxu1 %v188_v28 }
 0x13c   :  { %v266_v33 = vpop.f32.mrf.mxu1 }
 0x13d   :  { %v267_v35 = vadd.f32 %v531_v34, %v266_v33 }
 0x13f   :  { %v271_v38 = vmax.f32 %v267_v35, 0.0 }
 0x144   :  { %v268_v36 = vpop.f32.mrf.mxu1 }
 0x145   :  { %v269_v37 = vadd.f32 %v531_v34, %v268_v36 }
 0x147   :  { %v272_v39 = vmax.f32 %v269_v37, 0.0 }
 0x149   :  { %v273_v40 = vpack.c.bf16 %v272_v39, %v271_v38 }
 0x14b   :  { %350 = vmatmul.bf16.vlgmr.msra.gmra.mxu2 %v273_v40 }
 0x1ce   :  { %v351_v41 = vpop.f32.mrf.mxu2 }
 0x1cf   :  { %v352_v43 = vadd.f32 %v532_v42, %v351_v41 }
 0x1d1   :  { %v360_v46 = vmax.f32 %v352_v43, %v533_v44 }
 0x1d3   :  { %v366_v50 = vmin.f32 %v360_v46, %v534_v47 }
 0x1d6   :  { %v353_v45 = vpop.f32.mrf.mxu2 }
 0x1d7   :  { %v354_v48 = vadd.f32 %v532_v42, %v353_v45 }
 0x1d9   :  { %v361_v49 = vmax.f32 %v354_v48, %v533_v44 }
 0x1db   :  { %v367_v51 = vmin.f32 %v361_v49, %v534_v47 }
 0x1dd   :  { %v521_v52 = vpack.c.bf16 %v367_v51, %v366_v50 }
 0x1df   :  { %522 = vst [vmem:[#allocation10] sm:$0xff] %v521_v52  }
 0x1e0   :  { %384 = dma.vmem_to_hbm [thread:$0]  %s377_s15, 128, %s379_s20, [#allocation4], %s664_s17, %s664_s17, %s665_s18  }
 0x1e1   :  { %661 = dma.done.wait [#allocation4], 128  }
 0x1e2   :  { %662 = vsyncadd [#allocation4], 4294967168 }
 0x1e3   :  { %389 = vsyncpa [#allocation3], 1 }
 0x1e4   :  { %390 = vsyncpa [#allocation6], 1 }
 0x1e5   :  { %391 = vsyncpa [#allocation9], 1 }
 0x1e6   :  { %392 = vsyncpa [#allocation4], 1 }

</bundles_post_ra>
